<compile_context>
chip_gen: v6e
topology: v6e:2x2x1
jax: 0.10.0
libtpu: 0.0.40
codegen_flags: <defaults>
</compile_context>

<pallas_src>
import functools

import jax
import jax.numpy as jnp
import numpy as np
from jax.experimental import pallas as pl
from jax.experimental.pallas import tpu as pltpu


# ----------------------------------------------------------------------------
# Pallas kernel: both Q heads for one batch tile.
# ----------------------------------------------------------------------------
def _critic_kernel(oa_ref, w1_ref, w2_ref, b2_ref, w3_ref, b3_ref, out_ref, *, hidden):
    H = hidden
    oa = oa_ref[...]                                   # [T, in+1]  (last column is ones)

    # Layer 1, both heads fused: [T, 2H].  Bias folded into last row of w1.
    h = jnp.dot(oa, w1_ref[...], preferred_element_type=jnp.float32)
    h = jnp.maximum(h, 0.0)

    # Layer 2, per head.  Lane split at H (aligned when H % 128 == 0, the fast path).
    g1 = jnp.dot(h[:, :H], w2_ref[0], preferred_element_type=jnp.float32) + b2_ref[0:1, :H]
    g2 = jnp.dot(h[:, H:], w2_ref[1], preferred_element_type=jnp.float32) + b2_ref[0:1, H:]
    g1 = jnp.maximum(g1, 0.0)
    g2 = jnp.maximum(g2, 0.0)

    # Layer 3: VPU multiply + lane reduction (avoids an N=1 MXU matmul).
    q1 = jnp.sum(g1 * w3_ref[0:1, :], axis=-1, keepdims=True) + b3_ref[0]   # [T, 1]
    q2 = jnp.sum(g2 * w3_ref[1:2, :], axis=-1, keepdims=True) + b3_ref[1]   # [T, 1]

    # Single output slab: q1 in lane 0, q2 in lane 1.
    out_ref[...] = jnp.concatenate([q1, q2], axis=1)                        # [T, 2]


# ----------------------------------------------------------------------------
# Wrapper
# ----------------------------------------------------------------------------
def critic_forward(obs, action, packed, *, batch_tile=None):
    """Pallas implementation of Critic.forward for from_pixels=False.

    Returns (q1, q2, obs) exactly like the PyTorch module.
    `packed` is produced by `pack_critic_params`.
    """
    B, obs_dim = obs.shape
    Ba, act_dim = action.shape
    assert B == Ba, "obs.size(0) == action.size(0)"

    hidden = packed["w3"].shape[1]
    in_aug = packed["w1"].shape[0]
    assert in_aug == obs_dim + act_dim + 1

    # Concatenate once in the wrapper (cheap XLA op) and append a ones column so the
    # layer-1 bias rides along as an extra weight row.
    ones = jnp.ones((B, 1), jnp.float32)
    oa = jnp.concatenate(
        [obs.astype(jnp.float32), action.astype(jnp.float32), ones], axis=1)   # [B, in+1]

    if batch_tile is None:
        # Prefer 2 grid steps (so v7x's 2 TensorCores both get work) as long as each tile
        # still has a healthy M (>=128); otherwise process the whole batch in one step.
        if B % 2 == 0 and (B // 2) % 8 == 0 and B >= 256:
            batch_tile = B // 2
        else:
            batch_tile = B
    assert B % batch_tile == 0, "batch must divide evenly into batch_tile"

    grid = (B // batch_tile,)

    # Rough VMEM estimate (bytes): double-buffered activations + weights + scratch
    # activations.  Keeps v5e's 16 MiB scoped default from silently biting at large H,
    # while staying well under v7x's 64 MiB physical VMEM.
    est = 4 * (
        2 * batch_tile * in_aug                      # oa (double-buffered)
        + 2 * batch_tile * 2                         # output (double-buffered)
        + 2 * (in_aug * 2 * hidden)                  # w1 (2 buffers)
        + 2 * (2 * hidden * hidden)                  # w2 stack (2 buffers)
        + 2 * (4 * hidden)                           # b2, w3 (2 buffers)
        + 4 * batch_tile * hidden                    # in-kernel activations (h, g1, g2, ...)
    )
    vmem_limit = int(min(max(est, 32 * 1024 * 1024), 64 * 1024 * 1024))

    kernel = functools.partial(_critic_kernel, hidden=hidden)

    out = pl.pallas_call(
        kernel,
        out_shape=jax.ShapeDtypeStruct((B, 2), jnp.float32),
        grid=grid,
        in_specs=[
            pl.BlockSpec((batch_tile, in_aug), lambda i: (i, 0)),      # oa tile
            pl.BlockSpec(packed["w1"].shape, lambda i: (0, 0)),        # [in+1, 2H]
            pl.BlockSpec(packed["w2"].shape, lambda i: (0, 0, 0)),     # [2, H, H]
            pl.BlockSpec(packed["b2"].shape, lambda i: (0, 0)),        # [1, 2H]
            pl.BlockSpec(packed["w3"].shape, lambda i: (0, 0)),        # [2, H]
            pl.BlockSpec(memory_space=pltpu.MemorySpace.SMEM),         # b3 scalars [2]
        ],
        out_specs=pl.BlockSpec((batch_tile, 2), lambda i: (i, 0)),
        compiler_params=pltpu.CompilerParams(
            dimension_semantics=("parallel",),
            vmem_limit_bytes=vmem_limit,
        ),
    )(oa, packed["w1"], packed["w2"], packed["b2"], packed["w3"], packed["b3"])

    q1 = out[:, 0:1]
    q2 = out[:, 1:2]
    return q1, q2, obs


# ----------------------------------------------------------------------------
# Parameter construction (torch layout) and packing for the kernel.
# ----------------------------------------------------------------------------
def init_q_head(key, obs_dim, act_dim, hidden):
    """Per-head params in torch Linear layout (weight [out, in], bias [out]).

    weight_init uses orthogonal weights and ZERO biases; here biases are small random
    values so the bias code path is actually exercised by the correctness check.
    """
    k1, k2, k3, kb1, kb2, kb3 = jax.random.split(key, 6)
    ortho = jax.nn.initializers.orthogonal()
    return {
        "w1": ortho(k1, (hidden, obs_dim + act_dim), jnp.float32),
        "b1": 0.1 * jax.random.normal(kb1, (hidden,), jnp.float32),
        "w2": ortho(k2, (hidden, hidden), jnp.float32),
        "b2": 0.1 * jax.random.normal(kb2, (hidden,), jnp.float32),
        "w3": ortho(k3, (1, hidden), jnp.float32),
        "b3": 0.1 * jax.random.normal(kb3, (1,), jnp.float32),
    }


def pack_critic_params(q1, q2):
    """Pack both heads' params into the fused layout the kernel consumes."""
    # Layer 1: both heads side-by-side on the output dim, bias folded in as a last row.
    w1_both = jnp.concatenate([q1["w1"].T, q2["w1"].T], axis=1)          # [in, 2H]
    b1_row = jnp.concatenate([q1["b1"], q2["b1"]])[None, :]              # [1, 2H]
    w1_aug = jnp.concatenate([w1_both, b1_row], axis=0)                  # [in+1, 2H]
    # Layer 2: per-head weights stacked on a leading head dim.
    w2_stack = jnp.stack([q1["w2"].T, q2["w2"].T], axis=0)               # [2, H, H]
    b2_row = jnp.concatenate([q1["b2"], q2["b2"]])[None, :]              # [1, 2H]
    # Layer 3: weight rows + scalar biases (SMEM).
    w3_rows = jnp.stack([q1["w3"][0], q2["w3"][0]], axis=0)              # [2, H]
    b3 = jnp.stack([q1["b3"][0], q2["b3"][0]])                           # [2]
    return {"w1": w1_aug, "w2": w2_stack, "b2": b2_row, "w3": w3_rows, "b3": b3}


def reference_forward(obs, action, heads):
    """Pure-JAX reference matching the PyTorch Critic (from_pixels=False)."""
    oa = jnp.concatenate([obs, action], axis=1)

    def q_head(p):
        h = jnp.maximum(oa @ p["w1"].T + p["b1"], 0.0)
        h = jnp.maximum(h @ p["w2"].T + p["b2"], 0.0)
        return h @ p["w3"].T + p["b3"]

    return q_head(heads["q1"]), q_head(heads["q2"]), obs


# ----------------------------------------------------------------------------
if __name__ == "__main__":
    key = jax.random.PRNGKey(0)
    k_obs, k_act, k_q1, k_q2 = jax.random.split(key, 4)

    # Hidden chosen as a multiple of 128 so the fused layer-1 split is lane-aligned.
    B, OBS_DIM, ACT_DIM, HIDDEN = 256, 10, 6, 128

    obs = jax.random.normal(k_obs, (B, OBS_DIM), dtype=jnp.float32)
    action = jax.random.uniform(k_act, (B, ACT_DIM), dtype=jnp.float32,
                                minval=-1.0, maxval=1.0)

    heads = {
        "q1": init_q_head(k_q1, OBS_DIM, ACT_DIM, HIDDEN),
        "q2": init_q_head(k_q2, OBS_DIM, ACT_DIM, HIDDEN),
    }
    packed = pack_critic_params(heads["q1"], heads["q2"])

    fwd = jax.jit(critic_forward)
    q1, q2, obs_out = fwd(obs, action, packed)
    jax.block_until_ready((q1, q2, obs_out))

    # Correctness check against pure-JAX reference.
    q1_ref, q2_ref, obs_ref = reference_forward(obs, action, heads)
    np.testing.assert_allclose(np.asarray(q1), np.asarray(q1_ref), rtol=1e-5, atol=1e-5)
    np.testing.assert_allclose(np.asarray(q2), np.asarray(q2_ref), rtol=1e-5, atol=1e-5)
    np.testing.assert_allclose(np.asarray(obs_out), np.asarray(obs_ref), rtol=0, atol=0)
    assert q1.shape == (B, 1) and q2.shape == (B, 1)

    print("KERNEL_OK")
</pallas_src>

<mosaic_0001>
module attributes {stable_mosaic.version = 11 : i64} {
  func.func @_critic_kernel(%arg0: i32, %arg1: memref<128x17xf32, #tpu.memory_space<vmem>>, %arg2: memref<17x256xf32, #tpu.memory_space<vmem>>, %arg3: memref<2x128x128xf32, #tpu.memory_space<vmem>>, %arg4: memref<1x256xf32, #tpu.memory_space<vmem>>, %arg5: memref<2x128xf32, #tpu.memory_space<vmem>>, %arg6: memref<2xf32, #tpu.memory_space<smem>>, %arg7: memref<128x2xf32, #tpu.memory_space<vmem>>) attributes {dimension_semantics = [#tpu.dimension_semantics<parallel>], iteration_bounds = array<i64: 2>, scalar_prefetch = 0 : i64, scratch_operands = 0 : i64, tpu.core_type = #tpu.core_type<tc>, window_params = [{transform_indices = @transform_0, window_bounds = array<i64: 128, 17>}, {pipeline_mode = #tpu.pipeline_mode<synchronous>, transform_indices = @transform_1, window_bounds = array<i64: 17, 256>}, {pipeline_mode = #tpu.pipeline_mode<synchronous>, transform_indices = @transform_2, window_bounds = array<i64: 2, 128, 128>}, {pipeline_mode = #tpu.pipeline_mode<synchronous>, transform_indices = @transform_3, window_bounds = array<i64: 1, 256>}, {pipeline_mode = #tpu.pipeline_mode<synchronous>, transform_indices = @transform_4, window_bounds = array<i64: 2, 128>}, {transform_indices = @transform_5, window_bounds = array<i64: 2>}, {transform_indices = @transform_6, window_bounds = array<i64: 128, 2>}]} {
    %c0 = arith.constant 0 : index
    %c0_0 = arith.constant 0 : index
    %0 = vector.load %arg1[%c0, %c0_0] : memref<128x17xf32, #tpu.memory_space<vmem>>, vector<128x17xf32>
    %c0_1 = arith.constant 0 : index
    %c0_2 = arith.constant 0 : index
    %1 = vector.load %arg2[%c0_1, %c0_2] : memref<17x256xf32, #tpu.memory_space<vmem>>, vector<17x256xf32>
    %cst = arith.constant dense<0.000000e+00> : vector<128x256xf32>
    %2 = tpu.matmul %0, %1, %cst {dimension_numbers = #tpu.dot_dimension_numbers<[1], [0], [0], [1], [0, 0, 1, 1], [], []>} : vector<128x17xf32>, vector<17x256xf32>, vector<128x256xf32> -> vector<128x256xf32>
    %cst_3 = arith.constant 0.000000e+00 : f32
    %3 = vector.broadcast %cst_3 : f32 to vector<128x256xf32>
    %4 = arith.maximumf %2, %3 : vector<128x256xf32>
    %5 = vector.extract_strided_slice %4 {offsets = [0, 0], sizes = [128, 128], strides = [1, 1]} : vector<128x256xf32> to vector<128x128xf32>
    %c0_4 = arith.constant 0 : index
    %c0_5 = arith.constant 0 : index
    %c0_6 = arith.constant 0 : index
    %6 = vector.load %arg3[%c0_4, %c0_5, %c0_6] : memref<2x128x128xf32, #tpu.memory_space<vmem>>, vector<1x128x128xf32>
    %7 = vector.shape_cast %6 : vector<1x128x128xf32> to vector<128x128xf32>
    %cst_7 = arith.constant dense<0.000000e+00> : vector<128x128xf32>
    %8 = tpu.matmul %5, %7, %cst_7 {dimension_numbers = #tpu.dot_dimension_numbers<[1], [0], [0], [1], [0, 0, 1, 1], [], []>} : vector<128x128xf32>, vector<128x128xf32>, vector<128x128xf32> -> vector<128x128xf32>
    %c0_8 = arith.constant 0 : index
    %c0_9 = arith.constant 0 : index
    %9 = vector.load %arg4[%c0_8, %c0_9] : memref<1x256xf32, #tpu.memory_space<vmem>>, vector<1x128xf32>
    %10 = vector.broadcast %9 : vector<1x128xf32> to vector<128x128xf32>
    %11 = arith.addf %8, %10 : vector<128x128xf32>
    %12 = vector.extract_strided_slice %4 {offsets = [0, 128], sizes = [128, 128], strides = [1, 1]} : vector<128x256xf32> to vector<128x128xf32>
    %c1 = arith.constant 1 : index
    %c0_10 = arith.constant 0 : index
    %c0_11 = arith.constant 0 : index
    %13 = vector.load %arg3[%c1, %c0_10, %c0_11] : memref<2x128x128xf32, #tpu.memory_space<vmem>>, vector<1x128x128xf32>
    %14 = vector.shape_cast %13 : vector<1x128x128xf32> to vector<128x128xf32>
    %cst_12 = arith.constant dense<0.000000e+00> : vector<128x128xf32>
    %15 = tpu.matmul %12, %14, %cst_12 {dimension_numbers = #tpu.dot_dimension_numbers<[1], [0], [0], [1], [0, 0, 1, 1], [], []>} : vector<128x128xf32>, vector<128x128xf32>, vector<128x128xf32> -> vector<128x128xf32>
    %c0_13 = arith.constant 0 : index
    %c128 = arith.constant 128 : index
    %16 = vector.load %arg4[%c0_13, %c128] : memref<1x256xf32, #tpu.memory_space<vmem>>, vector<1x128xf32>
    %17 = vector.broadcast %16 : vector<1x128xf32> to vector<128x128xf32>
    %18 = arith.addf %15, %17 : vector<128x128xf32>
    %cst_14 = arith.constant 0.000000e+00 : f32
    %19 = vector.broadcast %cst_14 : f32 to vector<128x128xf32>
    %20 = arith.maximumf %11, %19 : vector<128x128xf32>
    %cst_15 = arith.constant 0.000000e+00 : f32
    %21 = vector.broadcast %cst_15 : f32 to vector<128x128xf32>
    %22 = arith.maximumf %18, %21 : vector<128x128xf32>
    %c0_16 = arith.constant 0 : index
    %c0_17 = arith.constant 0 : index
    %23 = vector.load %arg5[%c0_16, %c0_17] : memref<2x128xf32, #tpu.memory_space<vmem>>, vector<1x128xf32>
    %24 = vector.broadcast %23 : vector<1x128xf32> to vector<128x128xf32>
    %25 = arith.mulf %20, %24 : vector<128x128xf32>
    %cst_18 = arith.constant dense<0.000000e+00> : vector<128xf32>
    %26 = vector.multi_reduction <add>, %25, %cst_18 [1] : vector<128x128xf32> to vector<128xf32>
    %27 = vector.shape_cast %26 : vector<128xf32> to vector<128x1xf32>
    %c0_19 = arith.constant 0 : index
    %28 = memref.load %arg6[%c0_19] : memref<2xf32, #tpu.memory_space<smem>>
    %29 = vector.broadcast %28 : f32 to vector<128x1xf32>
    %30 = arith.addf %27, %29 : vector<128x1xf32>
    %c1_20 = arith.constant 1 : index
    %c0_21 = arith.constant 0 : index
    %31 = vector.load %arg5[%c1_20, %c0_21] : memref<2x128xf32, #tpu.memory_space<vmem>>, vector<1x128xf32>
    %32 = vector.broadcast %31 : vector<1x128xf32> to vector<128x128xf32>
    %33 = arith.mulf %22, %32 : vector<128x128xf32>
    %cst_22 = arith.constant dense<0.000000e+00> : vector<128xf32>
    %34 = vector.multi_reduction <add>, %33, %cst_22 [1] : vector<128x128xf32> to vector<128xf32>
    %35 = vector.shape_cast %34 : vector<128xf32> to vector<128x1xf32>
    %c1_23 = arith.constant 1 : index
    %36 = memref.load %arg6[%c1_23] : memref<2xf32, #tpu.memory_space<smem>>
    %37 = vector.broadcast %36 : f32 to vector<128x1xf32>
    %38 = arith.addf %35, %37 : vector<128x1xf32>
    %39 = tpu.concatenate %30, %38 in 1 : vector<128x1xf32>, vector<128x1xf32> -> vector<128x2xf32>
    %c0_24 = arith.constant 0 : index
    %c0_25 = arith.constant 0 : index
    %40 = vector.load %arg7[%c0_24, %c0_25] : memref<128x2xf32, #tpu.memory_space<vmem>>, vector<128x2xf32>
    tpu.vector_store %arg7[%c0_24, %c0_25], %39 {strides = array<i32>} : memref<128x2xf32, #tpu.memory_space<vmem>>, vector<128x2xf32>,
    return
  }
  func.func @transform_0(%arg0: i32) -> (i32, i32) {
    %c0_i32 = arith.constant 0 : i32
    %c0_i32_0 = arith.constant 0 : i32
    return %arg0, %c0_i32 : i32, i32
  }
  func.func @transform_1(%arg0: i32) -> (i32, i32) {
    %c0_i32 = arith.constant 0 : i32
    %c0_i32_0 = arith.constant 0 : i32
    %c0_i32_1 = arith.constant 0 : i32
    return %c0_i32, %c0_i32_0 : i32, i32
  }
  func.func @transform_2(%arg0: i32) -> (i32, i32, i32) {
    %c0_i32 = arith.constant 0 : i32
    %c0_i32_0 = arith.constant 0 : i32
    %c0_i32_1 = arith.constant 0 : i32
    %c0_i32_2 = arith.constant 0 : i32
    return %c0_i32, %c0_i32_0, %c0_i32_1 : i32, i32, i32
  }
  func.func @transform_3(%arg0: i32) -> (i32, i32) {
    %c0_i32 = arith.constant 0 : i32
    %c0_i32_0 = arith.constant 0 : i32
    %c0_i32_1 = arith.constant 0 : i32
    return %c0_i32, %c0_i32_0 : i32, i32
  }
  func.func @transform_4(%arg0: i32) -> (i32, i32) {
    %c0_i32 = arith.constant 0 : i32
    %c0_i32_0 = arith.constant 0 : i32
    %c0_i32_1 = arith.constant 0 : i32
    return %c0_i32, %c0_i32_0 : i32, i32
  }
  func.func @transform_5(%arg0: i32) -> i32 {
    %c0_i32 = arith.constant 0 : i32
    %c0_i32_0 = arith.constant 0 : i32
    return %c0_i32 : i32
  }
  func.func @transform_6(%arg0: i32) -> (i32, i32) {
    %c0_i32 = arith.constant 0 : i32
    %c0_i32_0 = arith.constant 0 : i32
    return %arg0, %c0_i32 : i32, i32
  }
}

</mosaic_0001>

<bundles_post_ra>
// kernel: critic_forward.1
= control target key start
LH: loop header
LB: loop body
LE: loop exit
PB: predicated region body
PF: predicated region fallthrough
CT: control target
= control target key end

     0   :  { %11 = vsyncpa [#allocation3], 0  ;;  %s1497_s21 = smov 0   ;;  %s1976_s0 = inlined_call_operand.vmem [shape: f32[256,17], index: 0, kind: input, shape index: {}]   ;;  %s1977_s1 = inlined_call_operand.vmem [shape: f32[17,256], index: 1, kind: input, shape index: {}]   ;;  %s1978_s2 = inlined_call_operand.vmem [shape: f32[2,128,128], index: 2, kind: input, shape index: {}]   ;;  %s1979_s3 = inlined_call_operand.vmem [shape: f32[1,256], index: 3, kind: input, shape index: {}]   ;;  %s1980_s4 = inlined_call_operand.vmem [shape: f32[2,128], index: 4, kind: input, shape index: {}]   ;;  %s1981_s5 = inlined_call_operand.vmem [shape: f32[2], index: 5, kind: input, shape index: {}]   ;;  %s1982_s6 = inlined_call_operand.vmem [shape: f32[256,2], index: 6, kind: output, shape index: {}]  }
   0x1 LB: > { %s1153_s22 = sadd.s32 4294967295, %s1458_s21   ;;  %p1155_p0 = scmp.ge.s32.totalorder %s1458_s21, 1  ;;  %s1458_s21 = sphi %s1497_s21, %s17_s21  }
   0x2   : > { %p179_p1 = scmp.lt.s32.totalorder %s1458_s21, 3  ;;  %s204_s25 = sshll.u32 %s1981_s5, 4  ;;  %s205_s25 = int_to_ptr.vmem [resolvable:$true] %s204_s25 }
   0x3   : > { %p1514_p3 = scmp.eq.s32.totalorder %s1153_s22, 0  ;;  %s1433_s28 = scalar_lea.vmem %s205_s25, 16 }
   0x4   : > { %p1508_p2 = pnand %p1155_p0, %p179_p1  ;;  %p1434_p6 = scmp.ne.s32.totalorder %s205_s25, %s1433_s28 }
   0x5   : > { %p1441_p10 = scmp.lt.s32.totalorder %s205_s25, %s205_s25  ;;  %p1442_p11 = scmp.lt.s32.totalorder %s1433_s28, %s1433_s28 }
   0x6   : > { %p1417_p4 = pneg %p1508_p2 }
   0x7   : > { %p1443_p12 = por %p1442_p11, %p1441_p10 }
   0x8   : > { %p1418_p5 = pnand %p1514_p3, %p1417_p4 }
   0xa   : > { %p1435_p7 = pneg %p1418_p5 }
   0xc   : > { %p1436_p8 = pnand %p1435_p7, %p1434_p6 }
   0xe   : > { %p1437_p9 = pneg %p1436_p8 }
  0x10   : > { %p1444_p13 = pnand %p1443_p12, %p1437_p9 }
  0x12   : > { %1447 = shalt.err (!%p1444_p13)
}
  0x13   : > { %s1460_s29 = smov [#allocation2]   ;;  %226 = sbr.rel (%p1508_p2) target bundleno = 653 (0x28d), region = 44 }
  0x14   : > { %1420 = dma.vmem_to_smem (!%p1418_p5), %s205_s25, 16, %s1460_s29, [#allocation3]  }
  0x18   : > { %1453 = dma.done.wait (%p1514_p3), [#allocation3], 16  }
  0x19   : > { %1455 = vsyncadd (%p1514_p3), [#allocation3], 4294967280 }
  0x1a   : > { %232 = sfence }
  0x1b   : > { %v290_v0 = vld [vmem:[%s1977_s1 + $0x28] sm:$0x1]  ;;  %vm340_vm0 = vcmask 1040384   ;;  %v289_v1 = vld [vmem:[%s1977_s1 + $0x20] sm:$0x1]  ;;  %v288_v2 = vld [vmem:[%s1977_s1 + $0x18] sm:$0xff] }
  0x1c   : > { %1164 = vmatprep.subr.msk.mxu0 %vm340_vm0, %v290_v0  ;;  %v287_v3 = vld [vmem:[%s1977_s1 + $0x10] sm:$0xff]  ;;  %s1160_s14 = sshll.u32 %s1153_s22, 4  ;;  %v286_v4 = vld [vmem:[%s1977_s1 + $0x8] sm:$0xff]  ;;  %v1461_v5 = vmov 0.0   ;;  %v285_v6 = vld [vmem:[%s1977_s1] sm:$0xff]  ;;  %vm291_vm1 = vcmask 138240  }
  0x1d   : > { %1165 = vmatpush1.msk.msra.mxu0 %vm340_vm0, %v289_v1  ;;  %411 = vmatprep.mubr.f32.mxu0 %v1461_v5  ;;  %p258_p0 = scmp.lt.s32.totalorder %s1160_s14, 31  ;;  %v555_v7 = vld [vmem:[%s1978_s2 + $0x78] sm:$0xff]  ;;  %v554_v9 = vld [vmem:[%s1978_s2 + $0x70] sm:$0xff]  ;;  %v553_v10 = vld [vmem:[%s1978_s2 + $0x68] sm:$0xff]  ;;  %s962_s11 = sld [smem:[#allocation2]]  ;;  %vm1051_vm2 = vcmask 7168  }
  0x1e   : > { %375 = vmatprep.subr.mxu0 %v288_v2  ;;  %v1557_v8 = vld [vmem:[%s1978_s2 + $0xf8] sm:$0xff]  ;;  %1269 = vmatprep.subr.mxu1 %v555_v7  ;;  %v1578_v12 = vld [vmem:[%s1978_s2 + $0xf0] sm:$0xff]  ;;  %v552_v13 = vld [vmem:[%s1978_s2 + $0x60] sm:$0xff]  ;;  %s1202_s12 = sld [smem:[#allocation2 + $0x1]]  ;;  %vm1068_vm3 = vcmask 15360  }
  0x1f   : > { %376 = vmatpush1.msra.mxu0 %v287_v3  ;;  %s1986_s14 = smov (!%p258_p0, %s1160_s14), 31  ;;  %1270 = vmatpush3.msra.mxu1 %v555_v7  ;;  %v1590_v15 = vld [vmem:[%s1978_s2 + $0xe8] sm:$0xff]  ;;  %v1597_v16 = vld [vmem:[%s1978_s2 + $0xe0] sm:$0xff]  ;;  %v551_v17 = vld [vmem:[%s1978_s2 + $0x58] sm:$0xff] }
  0x20   : > { %377 = vmatprep.subr.mxu0 %v286_v4  ;;  %s1161_s28 = sshll.u32 %s1986_s14, 3  ;;  %1271 = vmatprep.subr.mxu1 %v554_v9  ;;  %v1610_v19 = vld [vmem:[%s1978_s2 + $0xd8] sm:$0xff]  ;;  %v1617_v20 = vld [vmem:[%s1978_s2 + $0xd0] sm:$0xff]  ;;  %v1630_v23 = vld [vmem:[%s1978_s2 + $0xc8] sm:$0xff] }
  0x21   : > { %378 = vmatpush1.msra.mxu0 %v285_v6  ;;  %s1571_s7 = scalar_lea.vmem %s1976_s0, %s1161_s28  ;;  %1272 = vmatpush3.msra.mxu1 %v554_v9  ;;  %v550_v21 = vld [vmem:[%s1978_s2 + $0x50] sm:$0xff]  ;;  %v549_v24 = vld [vmem:[%s1978_s2 + $0x48] sm:$0xff]  ;;  %v1640_v25 = vld [vmem:[%s1978_s2 + $0xc0] sm:$0xff]  ;;  %s1891_s16 = scalar_lea.vmem %s1982_s6, %s1161_s28 }
  0x22   : > { %1325 = vmatprep.subr.mxu0 %v1557_v8  ;;  %v269_v11 = vld [vmem:[%s1571_s7] sm:$0xff]  ;;  %1273 = vmatprep.subr.mxu1 %v553_v10  ;;  %v270_v14 = vld [vmem:[%s1571_s7 + $0x8] sm:$0xff]  ;;  %v271_v18 = vld [vmem:[%s1571_s7 + $0x10] sm:$0xff] }
  0x23   : > { %1166 = vmatmul.mubr.msk.f32.vlgmr.msra.gmra.mxu0 %vm291_vm1, %v269_v11  ;;  %1274 = vmatpush3.msra.mxu1 %v553_v10  ;;  %v272_v22 = vld [vmem:[%s1571_s7 + $0x18] sm:$0xff]  ;;  %v273_v26 = vld [vmem:[%s1571_s7 + $0x20] sm:$0xff]  ;;  %v274_v30 = vld [vmem:[%s1571_s7 + $0x28] sm:$0xff] }
  0x24   : > { %417 = vmatprep.mubr.f32.mxu0 %v1461_v5  ;;  %1326 = vmatpush3.msra.mxu0 %v1557_v8  ;;  %v548_v27 = vld [vmem:[%s1978_s2 + $0x40] sm:$0xff]  ;;  %v547_v28 = vld [vmem:[%s1978_s2 + $0x38] sm:$0xff]  ;;  %v546_v31 = vld [vmem:[%s1978_s2 + $0x30] sm:$0xff] }
  0x25   : > { %1327 = vmatprep.subr.mxu0 %v1578_v12  ;;  %1275 = vmatprep.subr.mxu1 %v552_v13  ;;  %v1658_v29 = vld [vmem:[%s1978_s2 + $0xb8] sm:$0xff]  ;;  %v545_v32 = vld [vmem:[%s1978_s2 + $0x28] sm:$0xff]  ;;  %v1674_v33 = vld [vmem:[%s1978_s2 + $0xb0] sm:$0xff] }
  0x26   : > { %1328 = vmatpush3.msra.mxu0 %v1578_v12  ;;  %1276 = vmatpush3.msra.mxu1 %v552_v13  ;;  %v275_v34 = vld [vmem:[%s1571_s7 + $0x30] sm:$0xff]  ;;  %v544_v35 = vld [vmem:[%s1978_s2 + $0x20] sm:$0xff]  ;;  %v1686_v36 = vld [vmem:[%s1978_s2 + $0xa8] sm:$0xff] }
  0x27   : > { %1167 = vmatmul.mubr.msk.f32.gmra.mxu0 %vm291_vm1, %v270_v14  ;;  %1329 = vmatprep.subr.mxu0 %v1590_v15  ;;  %v543_v37 = vld [vmem:[%s1978_s2 + $0x18] sm:$0xff]  ;;  %v1696_v38 = vld [vmem:[%s1978_s2 + $0xa0] sm:$0xff]  ;;  %v278_v41 = vld [vmem:[%s1571_s7 + $0x48] sm:$0xff] }
  0x28   : > { %423 = vmatprep.mubr.f32.mxu0 %v1461_v5  ;;  %1330 = vmatpush3.msra.mxu0 %v1590_v15  ;;  %v276_v39 = vld [vmem:[%s1571_s7 + $0x38] sm:$0xff]  ;;  %v277_v40 = vld [vmem:[%s1571_s7 + $0x40] sm:$0xff]  ;;  %v279_v42 = vld [vmem:[%s1571_s7 + $0x50] sm:$0xff] }
  0x29   : > { %1331 = vmatprep.subr.mxu0 %v1597_v16  ;;  %1277 = vmatprep.subr.mxu1 %v551_v17  ;;  %v280_v43 = vld [vmem:[%s1571_s7 + $0x58] sm:$0xff]  ;;  %v281_v44 = vld [vmem:[%s1571_s7 + $0x60] sm:$0xff]  ;;  %v282_v45 = vld [vmem:[%s1571_s7 + $0x68] sm:$0xff] }
  0x2a   : > { %1332 = vmatpush3.msra.mxu0 %v1597_v16  ;;  %1278 = vmatpush3.msra.mxu1 %v551_v17  ;;  %v283_v46 = vld [vmem:[%s1571_s7 + $0x70] sm:$0xff]  ;;  %v284_v47 = vld [vmem:[%s1571_s7 + $0x78] sm:$0xff]  ;;  %v541_v50 = vld [vmem:[%s1978_s2 + $0x8] sm:$0xff] }
  0x2b   : > { %1168 = vmatmul.mubr.msk.f32.gmra.mxu0 %vm291_vm1, %v271_v18  ;;  %1333 = vmatprep.subr.mxu0 %v1610_v19  ;;  %v542_v48 = vld [vmem:[%s1978_s2 + $0x10] sm:$0xff]  ;;  %v1735_v49 = vld [vmem:[%s1978_s2 + $0x98] sm:$0xff]  ;;  %v540_v52 = vld [vmem:[%s1978_s2] sm:$0xff] }
  0x2c   : > { %429 = vmatprep.mubr.f32.mxu0 %v1461_v5  ;;  %1334 = vmatpush3.msra.mxu0 %v1610_v19  ;;  %v1745_v51 = vld [vmem:[%s1978_s2 + $0x90] sm:$0xff]  ;;  %v1755_v53 = vld [vmem:[%s1978_s2 + $0x88] sm:$0xff]  ;;  %v1762_v54 = vld [vmem:[%s1978_s2 + $0x80] sm:$0xff] }
  0x2d   : > { %1335 = vmatprep.subr.mxu0 %v1617_v20  ;;  %1279 = vmatprep.subr.mxu1 %v550_v21 }
  0x2e   : > { %1336 = vmatpush3.msra.mxu0 %v1617_v20  ;;  %1280 = vmatpush3.msra.mxu1 %v550_v21 }
  0x2f   : > { %1169 = vmatmul.mubr.msk.f32.gmra.mxu0 %vm291_vm1, %v272_v22  ;;  %1337 = vmatprep.subr.mxu0 %v1630_v23 }
  0x30   : > { %435 = vmatprep.mubr.f32.mxu0 %v1461_v5  ;;  %1338 = vmatpush3.msra.mxu0 %v1630_v23 }
  0x31   : > { %1281 = vmatprep.subr.mxu1 %v549_v24  ;;  %1339 = vmatprep.subr.mxu0 %v1640_v25 }
  0x32   : > { %1282 = vmatpush3.msra.mxu1 %v549_v24  ;;  %1340 = vmatpush3.msra.mxu0 %v1640_v25 }
  0x33   : > { %1170 = vmatmul.mubr.msk.f32.gmra.mxu0 %vm291_vm1, %v273_v26  ;;  %1283 = vmatprep.subr.mxu1 %v548_v27 }
  0x34   : > { %441 = vmatprep.mubr.f32.mxu0 %v1461_v5  ;;  %1284 = vmatpush3.msra.mxu1 %v548_v27 }
  0x35   : > { %1285 = vmatprep.subr.mxu1 %v547_v28  ;;  %1341 = vmatprep.subr.mxu0 %v1658_v29 }
  0x36   : > { %1286 = vmatpush3.msra.mxu1 %v547_v28  ;;  %1342 = vmatpush3.msra.mxu0 %v1658_v29 }
  0x37   : > { %1171 = vmatmul.mubr.msk.f32.gmra.mxu0 %vm291_vm1, %v274_v30  ;;  %1287 = vmatprep.subr.mxu1 %v546_v31 }
  0x38   : > { %447 = vmatprep.mubr.f32.mxu0 %v1461_v5  ;;  %1288 = vmatpush3.msra.mxu1 %v546_v31 }
  0x39   : > { %1289 = vmatprep.subr.mxu1 %v545_v32  ;;  %1343 = vmatprep.subr.mxu0 %v1674_v33 }
  0x3a   : > { %1290 = vmatpush3.msra.mxu1 %v545_v32  ;;  %1344 = vmatpush3.msra.mxu0 %v1674_v33 }
  0x3b   : > { %1172 = vmatmul.mubr.msk.f32.gmra.mxu0 %vm291_vm1, %v275_v34  ;;  %1291 = vmatprep.subr.mxu1 %v544_v35 }
  0x3c   : > { %453 = vmatprep.mubr.f32.mxu0 %v1461_v5  ;;  %1345 = vmatprep.subr.mxu0 %v1686_v36 }
  0x3d   : > { %1292 = vmatpush3.msra.mxu1 %v544_v35  ;;  %1346 = vmatpush3.msra.mxu0 %v1686_v36 }
  0x3e   : > { %1293 = vmatprep.subr.mxu1 %v543_v37  ;;  %1347 = vmatprep.subr.mxu0 %v1696_v38 }
  0x3f   : > { %1173 = vmatmul.mubr.msk.f32.gmra.mxu0 %vm291_vm1, %v276_v39  ;;  %1294 = vmatpush3.msra.mxu1 %v543_v37 }
  0x40   : > { %459 = vmatprep.mubr.f32.mxu0 %v1461_v5  ;;  %1348 = vmatpush3.msra.mxu0 %v1696_v38 }
  0x41   : > { %1295 = vmatprep.subr.mxu1 %v542_v48  ;;  %1349 = vmatprep.subr.mxu0 %v1735_v49 }
  0x42   : > { %1296 = vmatpush3.msra.mxu1 %v542_v48  ;;  %1350 = vmatpush3.msra.mxu0 %v1735_v49 }
  0x43   : > { %1174 = vmatmul.mubr.msk.f32.gmra.mxu0 %vm291_vm1, %v277_v40  ;;  %1297 = vmatprep.subr.mxu1 %v541_v50 }
  0x44   : > { %465 = vmatprep.mubr.f32.mxu0 %v1461_v5  ;;  %1351 = vmatprep.subr.mxu0 %v1745_v51 }
  0x45   : > { %1298 = vmatpush3.msra.mxu1 %v541_v50  ;;  %1352 = vmatpush3.msra.mxu0 %v1745_v51 }
  0x46   : > { %1299 = vmatprep.subr.mxu1 %v540_v52  ;;  %1353 = vmatprep.subr.mxu0 %v1755_v53 }
  0x47   : > { %1175 = vmatmul.mubr.msk.f32.gmra.mxu0 %vm291_vm1, %v278_v41  ;;  %1300 = vmatpush3.msra.mxu1 %v540_v52 }
  0x48   : > { %471 = vmatprep.mubr.f32.mxu0 %v1461_v5  ;;  %1354 = vmatpush3.msra.mxu0 %v1755_v53 }
  0x49   : > { %1355 = vmatprep.subr.mxu0 %v1762_v54  ;;  %1381 = vmatprep.subr.mxu1 %v1557_v8 }
  0x4a   : > { %1356 = vmatpush3.msra.mxu0 %v1762_v54 }
  0x4b   : > { %1176 = vmatmul.mubr.msk.f32.gmra.mxu0 %vm291_vm1, %v279_v42 }
  0x4c   : > { %477 = vmatprep.mubr.f32.mxu0 %v1461_v5 }
  0x4f   : > { %1177 = vmatmul.mubr.msk.f32.gmra.mxu0 %vm291_vm1, %v280_v43 }
  0x50   : > { %483 = vmatprep.mubr.f32.mxu0 %v1461_v5 }
  0x53   : > { %1178 = vmatmul.mubr.msk.f32.gmra.mxu0 %vm291_vm1, %v281_v44 }
  0x54   : > { %489 = vmatprep.mubr.f32.mxu0 %v1461_v5 }
  0x57   : > { %1179 = vmatmul.mubr.msk.f32.gmra.mxu0 %vm291_vm1, %v282_v45 }
  0x58   : > { %495 = vmatprep.mubr.f32.mxu0 %v1461_v5 }
  0x5b   : > { %1180 = vmatmul.mubr.msk.f32.gmra.mxu0 %vm291_vm1, %v283_v46 }
  0x5c   : > { %501 = vmatprep.mubr.f32.mxu0 %v1461_v5 }
  0x5f   : > { %1181 = vmatmul.mubr.msk.f32.gmra.mxu0 %vm291_vm1, %v284_v47 }
  0xe3   : > { %v413_v55 = vpop.f32.mrf.mxu0 }
  0xe4   : > { %v508_v56 = vmax.f32 %v413_v55, 0.0  ;;  %v1801_v55 = vld [vmem:[%s1979_s3] ss:$0 sm:$0xff] }
  0xe5   : > { %v415_v57 = vpop.f32.mrf.mxu0 }
  0xe6   : > { %v509_v58 = vmax.f32 %v415_v57, 0.0  ;;  %1301 = vmatprep.mubr.f32.mxu1 %v508_v56  ;;  %v1806_v57 = vld [vmem:[%s1979_s3 + $0x1] ss:$0 sm:$0xff] }
  0xe7   : > { %v419_v59 = vpop.f32.mrf.mxu0 }
  0xe8   : > { %v510_v60 = vmax.f32 %v419_v59, 0.0  ;;  %1357 = vmatprep.mubr.f32.mxu0 %v509_v58 }
  0xe9   : > { %v421_v61 = vpop.f32.mrf.mxu0 }
  0xea   : > { %v511_v62 = vmax.f32 %v421_v61, 0.0  ;;  %1302 = vmatmul.mubr.f32.vlgmr.msra.gmra.mxu1 %v510_v60  ;;  %v1812_v61 = vld [vmem:[%s1980_s4] ss:$0 sm:$0xff] }
  0xeb   : > { %v425_v63 = vpop.f32.mrf.mxu0  ;;  %1397 = vmatpush3.msra.mxu1 %v1557_v8 }
  0xec   : > { %v512_v0 = vmax.f32 %v425_v63, 0.0  ;;  %1358 = vmatmul.mubr.f32.vlgmr.msra.gmra.mxu0 %v511_v62  ;;  %1382 = vmatprep.subr.mxu1 %v1578_v12 }
  0xed   : > { %v427_v1 = vpop.f32.mrf.mxu0  ;;  %1398 = vmatpush3.msra.mxu1 %v1578_v12 }
  0xee   : > { %v513_v2 = vmax.f32 %v427_v1, 0.0  ;;  %1304 = vmatprep.mubr.f32.mxu1 %v512_v0  ;;  %1383 = vmatprep.subr.mxu1 %v1590_v15 }
  0xef   : > { %v431_v3 = vpop.f32.mrf.mxu0  ;;  %1399 = vmatpush3.msra.mxu1 %v1590_v15 }
  0xf0   : > { %v514_v4 = vmax.f32 %v431_v3, 0.0  ;;  %1360 = vmatprep.mubr.f32.mxu0 %v513_v2  ;;  %1384 = vmatprep.subr.mxu1 %v1597_v16  ;;  %v1819_v2 = vld [vmem:[%s1980_s4 + $0x1] ss:$0 sm:$0xff] }
  0xf1   : > { %v433_v5 = vpop.f32.mrf.mxu0  ;;  %1400 = vmatpush3.msra.mxu1 %v1597_v16 }
  0xf2   : > { %v515_v6 = vmax.f32 %v433_v5, 0.0  ;;  %1305 = vmatmul.mubr.f32.gmra.mxu1 %v514_v4  ;;  %1385 = vmatprep.subr.mxu1 %v1610_v19 }
  0xf3   : > { %v437_v7 = vpop.f32.mrf.mxu0  ;;  %1401 = vmatpush3.msra.mxu1 %v1610_v19 }
  0xf4   : > { %v516_v8 = vmax.f32 %v437_v7, 0.0  ;;  %1361 = vmatmul.mubr.f32.gmra.mxu0 %v515_v6  ;;  %1386 = vmatprep.subr.mxu1 %v1617_v20 }
  0xf5   : > { %v439_v9 = vpop.f32.mrf.mxu0  ;;  %1402 = vmatpush3.msra.mxu1 %v1617_v20 }
  0xf6   : > { %v517_v10 = vmax.f32 %v439_v9, 0.0  ;;  %1307 = vmatprep.mubr.f32.mxu1 %v516_v8  ;;  %1387 = vmatprep.subr.mxu1 %v1630_v23 }
  0xf7   : > { %v443_v11 = vpop.f32.mrf.mxu0  ;;  %1403 = vmatpush3.msra.mxu1 %v1630_v23 }
  0xf8   : > { %v518_v12 = vmax.f32 %v443_v11, 0.0  ;;  %1363 = vmatprep.mubr.f32.mxu0 %v517_v10  ;;  %1388 = vmatprep.subr.mxu1 %v1640_v25 }
  0xf9   : > { %v445_v13 = vpop.f32.mrf.mxu0  ;;  %1404 = vmatpush3.msra.mxu1 %v1640_v25 }
  0xfa   : > { %v519_v14 = vmax.f32 %v445_v13, 0.0  ;;  %1308 = vmatmul.mubr.f32.gmra.mxu1 %v518_v12  ;;  %1389 = vmatprep.subr.mxu1 %v1658_v29 }
  0xfb   : > { %v449_v15 = vpop.f32.mrf.mxu0  ;;  %1405 = vmatpush3.msra.mxu1 %v1658_v29 }
  0xfc   : > { %v520_v16 = vmax.f32 %v449_v15, 0.0  ;;  %1364 = vmatmul.mubr.f32.gmra.mxu0 %v519_v14  ;;  %1390 = vmatprep.subr.mxu1 %v1674_v33 }
  0xfd   : > { %v451_v17 = vpop.f32.mrf.mxu0  ;;  %1406 = vmatpush3.msra.mxu1 %v1674_v33 }
  0xfe   : > { %1310 = vmatprep.mubr.f32.mxu1 %v520_v16  ;;  %1391 = vmatprep.subr.mxu1 %v1686_v36  ;;  %v521_v44 = vmax.f32 %v451_v17, 0.0 }
  0xff   : > { %v455_v18 = vpop.f32.mrf.mxu0  ;;  %1407 = vmatpush3.msra.mxu1 %v1686_v36 }
 0x100   : > { %v522_v19 = vmax.f32 %v455_v18, 0.0  ;;  %1392 = vmatprep.subr.mxu1 %v1696_v38 }
 0x101   : > { %v457_v20 = vpop.f32.mrf.mxu0  ;;  %1408 = vmatpush3.msra.mxu1 %v1696_v38 }
 0x102   : > { %1311 = vmatmul.mubr.f32.gmra.mxu1 %v522_v19  ;;  %1393 = vmatprep.subr.mxu1 %v1735_v49  ;;  %v523_v45 = vmax.f32 %v457_v20, 0.0 }
 0x103   : > { %v461_v21 = vpop.f32.mrf.mxu0  ;;  %1409 = vmatpush3.msra.mxu1 %v1735_v49 }
 0x104   : > { %v524_v22 = vmax.f32 %v461_v21, 0.0  ;;  %1394 = vmatprep.subr.mxu1 %v1745_v51 }
 0x105   : > { %v463_v23 = vpop.f32.mrf.mxu0  ;;  %1410 = vmatpush3.msra.mxu1 %v1745_v51 }
 0x106   : > { %1313 = vmatprep.mubr.f32.mxu1 %v524_v22  ;;  %1395 = vmatprep.subr.mxu1 %v1755_v53  ;;  %v525_v46 = vmax.f32 %v463_v23, 0.0 }
 0x107   : > { %v467_v24 = vpop.f32.mrf.mxu0  ;;  %1411 = vmatpush3.msra.mxu1 %v1755_v53 }
 0x108   : > { %v526_v25 = vmax.f32 %v467_v24, 0.0  ;;  %1396 = vmatprep.subr.mxu1 %v1762_v54 }
 0x109   : > { %v469_v26 = vpop.f32.mrf.mxu0  ;;  %1412 = vmatpush3.msra.mxu1 %v1762_v54 }
 0x10a   : > { %1314 = vmatmul.mubr.f32.gmra.mxu1 %v526_v25  ;;  %v527_v47 = vmax.f32 %v469_v26, 0.0 }
 0x10b   : > { %v473_v27 = vpop.f32.mrf.mxu0 }
 0x10c   : > { %v528_v28 = vmax.f32 %v473_v27, 0.0 }
 0x10d   : > { %v475_v29 = vpop.f32.mrf.mxu0 }
 0x10e   : > { %1316 = vmatprep.mubr.f32.mxu1 %v528_v28  ;;  %v529_v48 = vmax.f32 %v475_v29, 0.0 }
 0x10f   : > { %v479_v30 = vpop.f32.mrf.mxu0 }
 0x110   : > { %v530_v31 = vmax.f32 %v479_v30, 0.0 }
 0x111   : > { %v481_v32 = vpop.f32.mrf.mxu0 }
 0x112   : > { %1317 = vmatmul.mubr.f32.gmra.mxu1 %v530_v31  ;;  %v531_v49 = vmax.f32 %v481_v32, 0.0 }
 0x113   : > { %v485_v33 = vpop.f32.mrf.mxu0 }
 0x114   : > { %v532_v34 = vmax.f32 %v485_v33, 0.0 }
 0x115   : > { %v487_v35 = vpop.f32.mrf.mxu0 }
 0x116   : > { %1319 = vmatprep.mubr.f32.mxu1 %v532_v34  ;;  %v533_v50 = vmax.f32 %v487_v35, 0.0 }
 0x117   : > { %v491_v36 = vpop.f32.mrf.mxu0 }
 0x118   : > { %v534_v37 = vmax.f32 %v491_v36, 0.0 }
 0x119   : > { %v493_v38 = vpop.f32.mrf.mxu0 }
 0x11a   : > { %1320 = vmatmul.mubr.f32.gmra.mxu1 %v534_v37  ;;  %v535_v51 = vmax.f32 %v493_v38, 0.0 }
 0x11b   : > { %v497_v39 = vpop.f32.mrf.mxu0 }
 0x11c   : > { %v536_v40 = vmax.f32 %v497_v39, 0.0 }
 0x11d   : > { %v499_v41 = vpop.f32.mrf.mxu0 }
 0x11e   : > { %1322 = vmatprep.mubr.f32.mxu1 %v536_v40  ;;  %v537_v52 = vmax.f32 %v499_v41, 0.0 }
 0x11f   : > { %v503_v42 = vpop.f32.mrf.mxu0 }
 0x120   : > { %v538_v43 = vmax.f32 %v503_v42, 0.0 }
 0x121   : > { %v505_v53 = vpop.f32.mrf.mxu0 }
 0x122   : > { %1323 = vmatmul.mubr.f32.gmra.mxu1 %v538_v43  ;;  %v539_v54 = vmax.f32 %v505_v53, 0.0 }
 0x123   : > { %1366 = vmatprep.mubr.f32.mxu1 %v521_v44 }
 0x126   : > { %1367 = vmatmul.mubr.f32.vlgmr.msra.gmra.mxu1 %v523_v45 }
 0x127   : > { %1369 = vmatprep.mubr.f32.mxu1 %v525_v46 }
 0x12a   : > { %1370 = vmatmul.mubr.f32.gmra.mxu1 %v527_v47 }
 0x12b   : > { %1372 = vmatprep.mubr.f32.mxu1 %v529_v48 }
 0x12e   : > { %1373 = vmatmul.mubr.f32.gmra.mxu1 %v531_v49 }
 0x12f   : > { %1375 = vmatprep.mubr.f32.mxu1 %v533_v50 }
 0x132   : > { %1376 = vmatmul.mubr.f32.gmra.mxu1 %v535_v51 }
 0x133   : > { %1378 = vmatprep.mubr.f32.mxu1 %v537_v52 }
 0x136   : > { %1379 = vmatmul.mubr.f32.gmra.mxu1 %v539_v54 }
 0x1aa   : > { %v1303_v56 = vpop.f32.mrf.mxu1 }
 0x1ab   : > { %v635_v58 = vadd.f32 %v1303_v56, %v1801_v55 }
 0x1ac   : > { %v629_v59 = vpop.f32.mrf.mxu1  ;;  %v1359_v60 = vpop.f32.mrf.mxu0 }
 0x1ad   : > { %v878_v62 = vmax.f32 %v635_v58, 0.0  ;;  %v630_v63 = vadd.f32 %v1801_v55, %v629_v59  ;;  %v804_v0 = vadd.f32 %v1359_v60, %v1806_v57 }
 0x1ae   : > { %v798_v1 = vpop.f32.mrf.mxu0 }
 0x1af   : > { %v877_v3 = vmax.f32 %v630_v63, 0.0  ;;  %v894_v4 = vmax.f32 %v804_v0, 0.0  ;;  %v799_v5 = vadd.f32 %v1806_v57, %v798_v1  ;;  %v915_v6 = vmul.f32 %v1812_v61, %v878_v62 }
 0x1b1   : > { %932 = vadd.xlane.f32.xlu0 %v915_v6  ;;  %v986_v7 = vmul.f32 %v1819_v2, %v894_v4  ;;  %v893_v9 = vmax.f32 %v799_v5, 0.0  ;;  %v914_v11 = vmul.f32 %v1812_v61, %v877_v3 }
 0x1b2   : > { %v1306_v8 = vpop.f32.mrf.mxu1 }
 0x1b3   : > { %v645_v10 = vadd.f32 %v1306_v8, %v1801_v55  ;;  %1003 = vadd.xlane.f32.xlu1 %v986_v7  ;;  %v985_v21 = vmul.f32 %v1819_v2, %v893_v9 }
 0x1b4   : > { %v639_v12 = vpop.f32.mrf.mxu1  ;;  %v1362_v13 = vpop.f32.mrf.mxu0 }
 0x1b5   : > { %v880_v14 = vmax.f32 %v645_v10, 0.0  ;;  %v640_v15 = vadd.f32 %v1801_v55, %v639_v12  ;;  %930 = vadd.xlane.f32.xlu0 %v914_v11  ;;  %v814_v16 = vadd.f32 %v1362_v13, %v1806_v57 }
 0x1b6   : > { %v808_v17 = vpop.f32.mrf.mxu0 }
 0x1b7   : > { %v879_v18 = vmax.f32 %v640_v15, 0.0  ;;  %v809_v19 = vadd.f32 %v1806_v57, %v808_v17  ;;  %v917_v20 = vmul.f32 %v1812_v61, %v880_v14  ;;  %v896_v23 = vmax.f32 %v814_v16, 0.0 }
 0x1b9   : > { %v895_v22 = vmax.f32 %v809_v19, 0.0  ;;  %936 = vadd.xlane.f32.xlu1 %v917_v20  ;;  %1001 = vadd.xlane.f32.xlu0 %v985_v21  ;;  %v916_v26 = vmul.f32 %v1812_v61, %v879_v18  ;;  %v988_v32 = vmul.f32 %v1819_v2, %v896_v23 }
 0x1ba   : > { %v1309_v24 = vpop.f32.mrf.mxu1 }
 0x1bb   : > { %v655_v25 = vadd.f32 %v1309_v24, %v1801_v55  ;;  %v987_v27 = vmul.f32 %v1819_v2, %v895_v22 }
 0x1bc   : > { %v649_v28 = vpop.f32.mrf.mxu1  ;;  %v1365_v29 = vpop.f32.mrf.mxu0 }
 0x1bd   : > { %v650_v30 = vadd.f32 %v1801_v55, %v649_v28  ;;  %934 = vadd.xlane.f32.xlu1 %v916_v26  ;;  %1005 = vadd.xlane.f32.xlu0 %v987_v27  ;;  %v882_v33 = vmax.f32 %v655_v25, 0.0  ;;  %v824_v35 = vadd.f32 %v1365_v29, %v1806_v57 }
 0x1be   : > { %v818_v31 = vpop.f32.mrf.mxu0 }
 0x1bf   : > { %v881_v34 = vmax.f32 %v650_v30, 0.0  ;;  %v819_v36 = vadd.f32 %v1806_v57, %v818_v31  ;;  %v898_v40 = vmax.f32 %v824_v35, 0.0  ;;  %v919_v42 = vmul.f32 %v1812_v61, %v882_v33 }
 0x1c1   : > { %v897_v37 = vmax.f32 %v819_v36, 0.0  ;;  %1007 = vadd.xlane.f32.xlu1 %v988_v32  ;;  %v918_v38 = vmul.f32 %v1812_v61, %v881_v34  ;;  %v990_v48 = vmul.f32 %v1819_v2, %v898_v40 }
 0x1c2   : > { %v1312_v39 = vpop.f32.mrf.mxu1 }
 0x1c3   : > { %v665_v41 = vadd.f32 %v1312_v39, %v1801_v55  ;;  %938 = vadd.xlane.f32.xlu0 %v918_v38  ;;  %v989_v45 = vmul.f32 %v1819_v2, %v897_v37 }
 0x1c4   : > { %v659_v43 = vpop.f32.mrf.mxu1 }
 0x1c5   : > { %v660_v44 = vadd.f32 %v1801_v55, %v659_v43  ;;  %940 = vadd.xlane.f32.xlu1 %v919_v42  ;;  %v884_v46 = vmax.f32 %v665_v41, 0.0 }
 0x1c7   : > { %v883_v47 = vmax.f32 %v660_v44, 0.0  ;;  %1009 = vadd.xlane.f32.xlu0 %v989_v45  ;;  %v921_v52 = vmul.f32 %v1812_v61, %v884_v46 }
 0x1c9   : > { %1011 = vadd.xlane.f32.xlu1 %v990_v48  ;;  %v920_v49 = vmul.f32 %v1812_v61, %v883_v47 }
 0x1ca   : > { %v1315_v50 = vpop.f32.mrf.mxu1 }
 0x1cb   : > { %v675_v51 = vadd.f32 %v1315_v50, %v1801_v55  ;;  %942 = vadd.xlane.f32.xlu0 %v920_v49 }
 0x1cc   : > { %v669_v53 = vpop.f32.mrf.mxu1 }
 0x1cd   : > { %v886_v54 = vmax.f32 %v675_v51, 0.0  ;;  %v670_v56 = vadd.f32 %v1801_v55, %v669_v53  ;;  %944 = vadd.xlane.f32.xlu1 %v921_v52 }
 0x1cf   : > { %v885_v58 = vmax.f32 %v670_v56, 0.0  ;;  %v923_v59 = vmul.f32 %v1812_v61, %v886_v54 }
 0x1d1   : > { %948 = vadd.xlane.f32.xlu1 %v923_v59  ;;  %v922_v60 = vmul.f32 %v1812_v61, %v885_v58 }
 0x1d2   : > { %v1318_v62 = vpop.f32.mrf.mxu1 }
 0x1d3   : > { %v685_v63 = vadd.f32 %v1318_v62, %v1801_v55  ;;  %946 = vadd.xlane.f32.xlu0 %v922_v60 }
 0x1d4   : > { %v679_v0 = vpop.f32.mrf.mxu1 }
 0x1d5   : > { %v888_v1 = vmax.f32 %v685_v63, 0.0  ;;  %v680_v3 = vadd.f32 %v1801_v55, %v679_v0  ;;  %v1882_v0 = vstv %s962_s11 }
 0x1d7   : > { %v887_v4 = vmax.f32 %v680_v3, 0.0  ;;  %v925_v5 = vmul.f32 %v1812_v61, %v888_v1  ;;  %v1884_v3 = vstv %s1202_s12 }
 0x1d9   : > { %952 = vadd.xlane.f32.xlu1 %v925_v5  ;;  %v924_v6 = vmul.f32 %v1812_v61, %v887_v4 }
 0x1da   : > { %v1321_v7 = vpop.f32.mrf.mxu1 }
 0x1db   : > { %v695_v8 = vadd.f32 %v1321_v7, %v1801_v55  ;;  %950 = vadd.xlane.f32.xlu0 %v924_v6 }
 0x1dc   : > { %v689_v9 = vpop.f32.mrf.mxu1 }
 0x1dd   : > { %v890_v10 = vmax.f32 %v695_v8, 0.0  ;;  %v690_v11 = vadd.f32 %v1801_v55, %v689_v9 }
 0x1df   : > { %v889_v12 = vmax.f32 %v690_v11, 0.0  ;;  %v927_v13 = vmul.f32 %v1812_v61, %v890_v10 }
 0x1e1   : > { %956 = vadd.xlane.f32.xlu1 %v927_v13  ;;  %v926_v14 = vmul.f32 %v1812_v61, %v889_v12 }
 0x1e2   : > { %v1324_v15 = vpop.f32.mrf.mxu1 }
 0x1e3   : > { %v705_v16 = vadd.f32 %v1324_v15, %v1801_v55  ;;  %954 = vadd.xlane.f32.xlu0 %v926_v14 }
 0x1e4   : > { %v699_v17 = vpop.f32.mrf.mxu1 }
 0x1e5   : > { %v892_v18 = vmax.f32 %v705_v16, 0.0  ;;  %v700_v19 = vadd.f32 %v1801_v55, %v699_v17 }
 0x1e6   : > { %v1368_v20 = vpop.f32.mrf.mxu1 }
 0x1e7   : > { %v891_v21 = vmax.f32 %v700_v19, 0.0  ;;  %v834_v22 = vadd.f32 %v1368_v20, %v1806_v57  ;;  %v929_v23 = vmul.f32 %v1812_v61, %v892_v18 }
 0x1e8   : > { %v828_v24 = vpop.f32.mrf.mxu1 }
 0x1e9   : > { %v900_v25 = vmax.f32 %v834_v22, 0.0  ;;  %v829_v26 = vadd.f32 %v1806_v57, %v828_v24  ;;  %960 = vadd.xlane.f32.xlu1 %v929_v23  ;;  %v928_v27 = vmul.f32 %v1812_v61, %v891_v21 }
 0x1ea   : > { %v1371_v28 = vpop.f32.mrf.mxu1 }
 0x1eb   : > { %v899_v29 = vmax.f32 %v829_v26, 0.0  ;;  %v844_v30 = vadd.f32 %v1371_v28, %v1806_v57  ;;  %958 = vadd.xlane.f32.xlu0 %v928_v27  ;;  %v992_v55 = vmul.f32 %v1819_v2, %v900_v25 }
 0x1ec   : > { %v838_v31 = vpop.f32.mrf.mxu1 }
 0x1ed   : > { %v902_v32 = vmax.f32 %v844_v30, 0.0  ;;  %v839_v33 = vadd.f32 %v1806_v57, %v838_v31  ;;  %1015 = vadd.xlane.f32.xlu1 %v992_v55  ;;  %v991_v34 = vmul.f32 %v1819_v2, %v899_v29 }
 0x1ee   : > { %v1374_v35 = vpop.f32.mrf.mxu1 }
 0x1ef   : > { %v901_v36 = vmax.f32 %v839_v33, 0.0  ;;  %v854_v37 = vadd.f32 %v1374_v35, %v1806_v57  ;;  %1013 = vadd.xlane.f32.xlu0 %v991_v34  ;;  %v994_v61 = vmul.f32 %v1819_v2, %v902_v32 }
 0x1f0   : > { %v848_v38 = vpop.f32.mrf.mxu1 }
 0x1f1   : > { %v904_v39 = vmax.f32 %v854_v37, 0.0  ;;  %v849_v40 = vadd.f32 %v1806_v57, %v848_v38  ;;  %1019 = vadd.xlane.f32.xlu1 %v994_v61  ;;  %v993_v41 = vmul.f32 %v1819_v2, %v901_v36 }
 0x1f2   : > { %v1377_v42 = vpop.f32.mrf.mxu1 }
 0x1f3   : > { %v903_v43 = vmax.f32 %v849_v40, 0.0  ;;  %v864_v44 = vadd.f32 %v1377_v42, %v1806_v57  ;;  %1017 = vadd.xlane.f32.xlu0 %v993_v41  ;;  %v996_v45 = vmul.f32 %v1819_v2, %v904_v39 }
 0x1f4   : > { %v858_v46 = vpop.f32.mrf.mxu1 }
 0x1f5   : > { %v906_v47 = vmax.f32 %v864_v44, 0.0  ;;  %v859_v48 = vadd.f32 %v1806_v57, %v858_v46  ;;  %1023 = vadd.xlane.f32.xlu1 %v996_v45  ;;  %v995_v49 = vmul.f32 %v1819_v2, %v903_v43 }
 0x1f6   : > { %v1380_v50 = vpop.f32.mrf.mxu1 }
 0x1f7   : > { %v905_v51 = vmax.f32 %v859_v48, 0.0  ;;  %v874_v52 = vadd.f32 %v1380_v50, %v1806_v57  ;;  %1021 = vadd.xlane.f32.xlu0 %v995_v49  ;;  %v998_v53 = vmul.f32 %v1819_v2, %v906_v47 }
 0x1f8   : > { %v868_v54 = vpop.f32.mrf.mxu1 }
 0x1f9   : > { %v908_v56 = vmax.f32 %v874_v52, 0.0  ;;  %v869_v58 = vadd.f32 %v1806_v57, %v868_v54  ;;  %1027 = vadd.xlane.f32.xlu1 %v998_v53  ;;  %v997_v59 = vmul.f32 %v1819_v2, %v905_v51 }
 0x1fb   : > { %v907_v60 = vmax.f32 %v869_v58, 0.0  ;;  %1025 = vadd.xlane.f32.xlu0 %v997_v59  ;;  %v1000_v62 = vmul.f32 %v1819_v2, %v908_v56 }
 0x1fd   : > { %1031 = vadd.xlane.f32.xlu1 %v1000_v62  ;;  %v999_v63 = vmul.f32 %v1819_v2, %v907_v60 }
 0x1ff   : > { %1029 = vadd.xlane.f32.xlu0 %v999_v63 }
 0x23a   : > { %v933_v1 = vpop.xlane.xlu0 %932 }
 0x23b   : > { %v965_v2 = vadd.f32 %v1882_v0, %v933_v1 }
 0x23c   : > { %v1004_v57 = vpop.xlane.xlu1 %1003 }
 0x23d   : > { %v1036_v4 = vadd.f32 %v1884_v3, %v1004_v57 }
 0x23e   : > { %v931_v5 = vpop.xlane.xlu0 %930 }
 0x23f   : > { %v1053_v6 = vsel %vm1051_vm2, %v965_v2, %v1036_v4  ;;  %v964_v9 = vadd.f32 %v1882_v0, %v931_v5 }
 0x240   : > { %1070 = vst.msk [vmem:[%s1891_s16 + $0x8] sm:$0xff] %vm1068_vm3, %v1053_v6 }
 0x242   : > { %v937_v7 = vpop.xlane.xlu1 %936  ;;  %v1002_v8 = vpop.xlane.xlu0 %1001 }
 0x243   : > { %v1035_v10 = vadd.f32 %v1884_v3, %v1002_v8  ;;  %v967_v18 = vadd.f32 %v1882_v0, %v937_v7 }
 0x245   : > { %v1052_v11 = vsel %vm1051_vm2, %v964_v9, %v1035_v10 }
 0x246   : > { %1069 = vst.msk [vmem:[%s1891_s16] sm:$0xff] %vm1068_vm3, %v1052_v11  ;;  %v935_v12 = vpop.xlane.xlu1 %934  ;;  %v1006_v13 = vpop.xlane.xlu0 %1005 }
 0x247   : > { %v966_v14 = vadd.f32 %v1882_v0, %v935_v12  ;;  %v1037_v15 = vadd.f32 %v1884_v3, %v1006_v13 }
 0x249   : > { %v1054_v16 = vsel %vm1051_vm2, %v966_v14, %v1037_v15 }
 0x24a   : > { %1071 = vst.msk [vmem:[%s1891_s16 + $0x10] sm:$0xff] %vm1068_vm3, %v1054_v16  ;;  %v1008_v17 = vpop.xlane.xlu1 %1007 }
 0x24b   : > { %v1038_v19 = vadd.f32 %v1884_v3, %v1008_v17 }
 0x24c   : > { %v939_v20 = vpop.xlane.xlu0 %938 }
 0x24d   : > { %v1055_v21 = vsel %vm1051_vm2, %v967_v18, %v1038_v19  ;;  %v968_v24 = vadd.f32 %v1882_v0, %v939_v20 }
 0x24e   : > { %1072 = vst.msk [vmem:[%s1891_s16 + $0x18] sm:$0xff] %vm1068_vm3, %v1055_v21  ;;  %v941_v22 = vpop.xlane.xlu1 %940 }
 0x24f   : > { %v969_v27 = vadd.f32 %v1882_v0, %v941_v22 }
 0x250   : > { %v1010_v23 = vpop.xlane.xlu0 %1009 }
 0x251   : > { %v1039_v25 = vadd.f32 %v1884_v3, %v1010_v23 }
 0x252   : > { %v1012_v26 = vpop.xlane.xlu1 %1011 }
 0x253   : > { %v1056_v28 = vsel %vm1051_vm2, %v968_v24, %v1039_v25  ;;  %v1040_v29 = vadd.f32 %v1884_v3, %v1012_v26 }
 0x254   : > { %1073 = vst.msk [vmem:[%s1891_s16 + $0x20] sm:$0xff] %vm1068_vm3, %v1056_v28  ;;  %v943_v31 = vpop.xlane.xlu0 %942 }
 0x255   : > { %v1057_v30 = vsel %vm1051_vm2, %v969_v27, %v1040_v29  ;;  %v970_v43 = vadd.f32 %v1882_v0, %v943_v31 }
 0x256   : > { %1074 = vst.msk [vmem:[%s1891_s16 + $0x28] sm:$0xff] %vm1068_vm3, %v1057_v30  ;;  %v945_v55 = vpop.xlane.xlu1 %944 }
 0x257   : > { %v971_v40 = vadd.f32 %v1882_v0, %v945_v55 }
 0x25a   : > { %v949_v32 = vpop.xlane.xlu1 %948 }
 0x25b   : > { %v973_v47 = vadd.f32 %v1882_v0, %v949_v32 }
 0x25c   : > { %v947_v33 = vpop.xlane.xlu0 %946 }
 0x25d   : > { %v972_v51 = vadd.f32 %v1882_v0, %v947_v33 }
 0x262   : > { %v953_v34 = vpop.xlane.xlu1 %952 }
 0x263   : > { %v975_v56 = vadd.f32 %v1882_v0, %v953_v34 }
 0x264   : > { %v951_v35 = vpop.xlane.xlu0 %950 }
 0x265   : > { %v974_v62 = vadd.f32 %v1882_v0, %v951_v35 }
 0x26a   : > { %v957_v36 = vpop.xlane.xlu1 %956 }
 0x26b   : > { %v977_v2 = vadd.f32 %v1882_v0, %v957_v36 }
 0x26c   : > { %v955_v37 = vpop.xlane.xlu0 %954 }
 0x26d   : > { %v976_v7 = vadd.f32 %v1882_v0, %v955_v37 }
 0x272   : > { %v961_v61 = vpop.xlane.xlu1 %960 }
 0x273   : > { %v979_v11 = vadd.f32 %v1882_v0, %v961_v61 }
 0x274   : > { %v959_v38 = vpop.xlane.xlu0 %958 }
 0x275   : > { %v978_v15 = vadd.f32 %v1882_v0, %v959_v38 }
 0x276   : > { %v1016_v39 = vpop.xlane.xlu1 %1015 }
 0x277   : > { %v1042_v41 = vadd.f32 %v1884_v3, %v1016_v39 }
 0x278   : > { %v1014_v42 = vpop.xlane.xlu0 %1013 }
 0x279   : > { %v1059_v44 = vsel %vm1051_vm2, %v971_v40, %v1042_v41  ;;  %v1041_v45 = vadd.f32 %v1884_v3, %v1014_v42 }
 0x27a   : > { %1076 = vst.msk [vmem:[%s1891_s16 + $0x38] sm:$0xff] %vm1068_vm3, %v1059_v44  ;;  %v1020_v46 = vpop.xlane.xlu1 %1019 }
 0x27b   : > { %v1058_v48 = vsel %vm1051_vm2, %v970_v43, %v1041_v45  ;;  %v1044_v49 = vadd.f32 %v1884_v3, %v1020_v46 }
 0x27c   : > { %1075 = vst.msk [vmem:[%s1891_s16 + $0x30] sm:$0xff] %vm1068_vm3, %v1058_v48  ;;  %v1018_v50 = vpop.xlane.xlu0 %1017 }
 0x27d   : > { %v1061_v52 = vsel %vm1051_vm2, %v973_v47, %v1044_v49  ;;  %v1043_v53 = vadd.f32 %v1884_v3, %v1018_v50 }
 0x27e   : > { %1078 = vst.msk [vmem:[%s1891_s16 + $0x48] sm:$0xff] %vm1068_vm3, %v1061_v52  ;;  %v1024_v54 = vpop.xlane.xlu1 %1023 }
 0x27f   : > { %v1060_v58 = vsel %vm1051_vm2, %v972_v51, %v1043_v53  ;;  %v1046_v59 = vadd.f32 %v1884_v3, %v1024_v54 }
 0x280   : > { %1077 = vst.msk [vmem:[%s1891_s16 + $0x40] sm:$0xff] %vm1068_vm3, %v1060_v58  ;;  %v1022_v60 = vpop.xlane.xlu0 %1021 }
 0x281   : > { %v1063_v63 = vsel %vm1051_vm2, %v975_v56, %v1046_v59  ;;  %v1045_v1 = vadd.f32 %v1884_v3, %v1022_v60 }
 0x282   : > { %1080 = vst.msk [vmem:[%s1891_s16 + $0x58] sm:$0xff] %vm1068_vm3, %v1063_v63  ;;  %v1028_v57 = vpop.xlane.xlu1 %1027 }
 0x283   : > { %v1062_v4 = vsel %vm1051_vm2, %v974_v62, %v1045_v1  ;;  %v1048_v5 = vadd.f32 %v1884_v3, %v1028_v57 }
 0x284   : > { %1079 = vst.msk [vmem:[%s1891_s16 + $0x50] sm:$0xff] %vm1068_vm3, %v1062_v4  ;;  %v1026_v6 = vpop.xlane.xlu0 %1025 }
 0x285   : > { %v1065_v8 = vsel %vm1051_vm2, %v977_v2, %v1048_v5  ;;  %v1047_v9 = vadd.f32 %v1884_v3, %v1026_v6 }
 0x286   : > { %1082 = vst.msk [vmem:[%s1891_s16 + $0x68] sm:$0xff] %vm1068_vm3, %v1065_v8  ;;  %v1032_v10 = vpop.xlane.xlu1 %1031 }
 0x287   : > { %v1064_v12 = vsel %vm1051_vm2, %v976_v7, %v1047_v9  ;;  %v1050_v13 = vadd.f32 %v1884_v3, %v1032_v10 }
 0x288   : > { %1081 = vst.msk [vmem:[%s1891_s16 + $0x60] sm:$0xff] %vm1068_vm3, %v1064_v12  ;;  %v1030_v14 = vpop.xlane.xlu0 %1029 }
 0x289   : > { %v1067_v16 = vsel %vm1051_vm2, %v979_v11, %v1050_v13  ;;  %v1049_v17 = vadd.f32 %v1884_v3, %v1030_v14 }
 0x28a   : > { %1084 = vst.msk [vmem:[%s1891_s16 + $0x78] sm:$0xff] %vm1068_vm3, %v1067_v16 }
 0x28b   : > { %v1066_v18 = vsel %vm1051_vm2, %v978_v15, %v1049_v17 }
 0x28c   : > { %1083 = vst.msk [vmem:[%s1891_s16 + $0x70] sm:$0xff] %vm1068_vm3, %v1066_v18 }
 0x28d PF: > { %s17_s21 = sadd.s32 1, %s1458_s21  }
 0x28e   : > { %p14_p1 = scmp.ge.s32.totalorder %s17_s21, 4  }
 0x290   :  { %16 = sbr.rel (!%p14_p1) target bundleno = 1 (0x1), region = 80 }
 0x295   :  { %1107 = vsyncpa [#allocation3], 1 }
 0x296   :  { %1109 = vsyncpa [#allocation3 + $0x1], 1 }

</bundles_post_ra>
